<compile_context>
chip_gen: v6e
topology: v6e:2x2x1
jax: 0.10.0
libtpu: 0.0.40
codegen_flags: <defaults>
</compile_context>

<pallas_src>
import jax
import jax.numpy as jnp
from jax.experimental import pallas as pl
from jax.experimental.pallas import tpu as pltpu


def _round_up(x: int, m: int) -> int:
    return ((x + m - 1) // m) * m


def _hybrid_ode_kernel(z0_ref, diag_ref, wq_ref, bq_ref, out_ref):
    # z0_ref:   (tb, D)      latent-state batch tile
    # diag_ref: (1, D)       diag(exp_At), precomputed in the wrapper
    # wq_ref:   (D, O_pad)   Q linear weight, transposed + lane-padded
    # bq_ref:   (1, O_pad)   Q linear bias, lane-padded
    # out_ref:  (tb, O_pad)
    h = jnp.tanh(z0_ref[...] * diag_ref[...])
    y = jnp.dot(h, wq_ref[...], preferred_element_type=jnp.float32) + bq_ref[...]
    out_ref[...] = y.astype(out_ref.dtype)


def hybrid_matrix_neural_ode_forward(z0, S, lambda_vals, Wq, bq, t_span):
    """Forward pass (EXP path). z0: (B, D); S: (D, D); lambda_vals: (D,);
    Wq: (O, D); bq: (O,); t_span: (t0, t1)."""
    B, D = z0.shape
    O = Wq.shape[0]

    delta_t = jnp.asarray(t_span[1], jnp.float32) - jnp.asarray(t_span[0], jnp.float32)

    # -------- parameter-only (batch-independent) path: plain JAX in the wrapper -----
    # TODO(synk): torch.linalg.pinv (SVD-based) has no Pallas equivalent; computed in JAX.
    S_f32 = S.astype(jnp.float32)
    pinv_S = jnp.linalg.pinv(S_f32)                                     # (D, D)
    exp_lam = jnp.exp(lambda_vals.astype(jnp.float32) * delta_t)        # (D,)
    # diag(S @ diag(exp_lam) @ pinv(S)) without forming the D x D product.
    diag = jnp.sum(S_f32 * exp_lam[None, :] * pinv_S.T, axis=1)         # (D,)
    diag2d = diag.reshape(1, D)

    # Lane-dense output: pad output dim up to a multiple of 128.
    O_pad = _round_up(O, 128)
    wq_t = jnp.zeros((D, O_pad), jnp.float32).at[:, :O].set(Wq.T.astype(jnp.float32))
    bq_p = jnp.zeros((1, O_pad), jnp.float32).at[:, :O].set(
        bq.astype(jnp.float32).reshape(1, O))

    # Batch tiling: sublane-aligned tile; pad batch so the grid divides evenly.
    tb = min(256, _round_up(B, 8))
    B_pad = _round_up(B, tb)
    z0_p = jnp.zeros((B_pad, D), jnp.float32).at[:B, :].set(z0.astype(jnp.float32))

    grid = (B_pad // tb,)
    out = pl.pallas_call(
        _hybrid_ode_kernel,
        out_shape=jax.ShapeDtypeStruct((B_pad, O_pad), jnp.float32),
        grid_spec=pltpu.PrefetchScalarGridSpec(
            num_scalar_prefetch=0,
            grid=grid,
            in_specs=[
                pl.BlockSpec((tb, D), lambda i: (i, 0)),       # z0 tile (pipelined)
                pl.BlockSpec((1, D), lambda i: (0, 0)),        # diag (resident)
                pl.BlockSpec((D, O_pad), lambda i: (0, 0)),    # Wq.T  (resident)
                pl.BlockSpec((1, O_pad), lambda i: (0, 0)),    # bq    (resident)
            ],
            out_specs=pl.BlockSpec((tb, O_pad), lambda i: (i, 0)),
        ),
        compiler_params=pltpu.CompilerParams(
            dimension_semantics=("parallel",)),
    )(z0_p, diag2d, wq_t, bq_p)

    return out[:B, :O]


def _reference_forward(z0, S, lambda_vals, Wq, bq, t_span):
    """Pure-JAX reference matching the PyTorch module."""
    delta_t = float(t_span[1]) - float(t_span[0])
    exp_lambda = jnp.exp(lambda_vals * delta_t)
    M = S @ jnp.diag(exp_lambda)
    exp_At = M @ jnp.linalg.pinv(S)
    zT = (jnp.einsum('dd,db->db', exp_At, z0.T)).T
    return jnp.tanh(zT) @ Wq.T + bq


if __name__ == "__main__":
    # Small shapes consistent with the module: latent_dim=32, output_dim=8, batch=2.
    B, D, O = 2, 32, 8
    t_span = (0.0, 1.0)

    key = jax.random.PRNGKey(0)
    k_s, k_lam, k_w, k_b, k_x = jax.random.split(key, 5)

    # Deterministic parameter init mirroring the module's __init__:
    #   S ~ U(0.01, 0.02), lambda ~ U(0.2, 0.6), Linear(D, O) default U(-1/sqrt(D), 1/sqrt(D)).
    S = jax.random.uniform(k_s, (D, D), jnp.float32, minval=0.01, maxval=0.02)
    lambda_vals = jax.random.uniform(k_lam, (D,), jnp.float32, minval=0.2, maxval=0.6)
    bound = 1.0 / jnp.sqrt(jnp.float32(D))
    Wq = jax.random.uniform(k_w, (O, D), jnp.float32, minval=-bound, maxval=bound)
    bq = jax.random.uniform(k_b, (O,), jnp.float32, minval=-bound, maxval=bound)

    x = jax.random.normal(k_x, (B, D), jnp.float32)

    y = hybrid_matrix_neural_ode_forward(x, S, lambda_vals, Wq, bq, t_span)
    y = jax.block_until_ready(y)

    y_ref = _reference_forward(x, S, lambda_vals, Wq, bq, t_span)
    assert y.shape == (B, O)
    assert jnp.allclose(y, y_ref, atol=1e-4, rtol=1e-4)

    print("KERNEL_OK")
</pallas_src>

<mosaic_0001>
module attributes {stable_mosaic.version = 11 : i64} {
  func.func @_hybrid_ode_kernel(%arg0: i32, %arg1: memref<8x32xf32, #tpu.memory_space<vmem>>, %arg2: memref<1x32xf32, #tpu.memory_space<vmem>>, %arg3: memref<32x128xf32, #tpu.memory_space<vmem>>, %arg4: memref<1x128xf32, #tpu.memory_space<vmem>>, %arg5: memref<8x128xf32, #tpu.memory_space<vmem>>) attributes {dimension_semantics = [#tpu.dimension_semantics<parallel>], iteration_bounds = array<i64: 1>, scalar_prefetch = 0 : i64, scratch_operands = 0 : i64, tpu.core_type = #tpu.core_type<tc>, window_params = [{transform_indices = @transform_0, window_bounds = array<i64: 8, 32>}, {pipeline_mode = #tpu.pipeline_mode<synchronous>, transform_indices = @transform_1, window_bounds = array<i64: 1, 32>}, {pipeline_mode = #tpu.pipeline_mode<synchronous>, transform_indices = @transform_2, window_bounds = array<i64: 32, 128>}, {pipeline_mode = #tpu.pipeline_mode<synchronous>, transform_indices = @transform_3, window_bounds = array<i64: 1, 128>}, {transform_indices = @transform_4, window_bounds = array<i64: 8, 128>}]} {
    %c0 = arith.constant 0 : index
    %c0_0 = arith.constant 0 : index
    %0 = vector.load %arg1[%c0, %c0_0] : memref<8x32xf32, #tpu.memory_space<vmem>>, vector<8x32xf32>
    %c0_1 = arith.constant 0 : index
    %c0_2 = arith.constant 0 : index
    %1 = vector.load %arg2[%c0_1, %c0_2] : memref<1x32xf32, #tpu.memory_space<vmem>>, vector<1x32xf32>
    %2 = vector.broadcast %1 : vector<1x32xf32> to vector<8x32xf32>
    %3 = arith.mulf %0, %2 : vector<8x32xf32>
    %4 = math.tanh %3 : vector<8x32xf32>
    %c0_3 = arith.constant 0 : index
    %c0_4 = arith.constant 0 : index
    %5 = vector.load %arg3[%c0_3, %c0_4] : memref<32x128xf32, #tpu.memory_space<vmem>>, vector<32x128xf32>
    %cst = arith.constant dense<0.000000e+00> : vector<8x128xf32>
    %6 = tpu.matmul %4, %5, %cst {dimension_numbers = #tpu.dot_dimension_numbers<[1], [0], [0], [1], [0, 0, 1, 1], [], []>} : vector<8x32xf32>, vector<32x128xf32>, vector<8x128xf32> -> vector<8x128xf32>
    %c0_5 = arith.constant 0 : index
    %c0_6 = arith.constant 0 : index
    %7 = vector.load %arg4[%c0_5, %c0_6] : memref<1x128xf32, #tpu.memory_space<vmem>>, vector<1x128xf32>
    %8 = vector.broadcast %7 : vector<1x128xf32> to vector<8x128xf32>
    %9 = arith.addf %6, %8 : vector<8x128xf32>
    %c0_7 = arith.constant 0 : index
    %c0_8 = arith.constant 0 : index
    %10 = vector.load %arg5[%c0_7, %c0_8] : memref<8x128xf32, #tpu.memory_space<vmem>>, vector<8x128xf32>
    tpu.vector_store %arg5[%c0_7, %c0_8], %9 {strides = array<i32>} : memref<8x128xf32, #tpu.memory_space<vmem>>, vector<8x128xf32>,
    return
  }
  func.func @transform_0(%arg0: i32) -> (i32, i32) {
    %c0_i32 = arith.constant 0 : i32
    %c0_i32_0 = arith.constant 0 : i32
    return %arg0, %c0_i32 : i32, i32
  }
  func.func @transform_1(%arg0: i32) -> (i32, i32) {
    %c0_i32 = arith.constant 0 : i32
    %c0_i32_0 = arith.constant 0 : i32
    %c0_i32_1 = arith.constant 0 : i32
    return %c0_i32, %c0_i32_0 : i32, i32
  }
  func.func @transform_2(%arg0: i32) -> (i32, i32) {
    %c0_i32 = arith.constant 0 : i32
    %c0_i32_0 = arith.constant 0 : i32
    %c0_i32_1 = arith.constant 0 : i32
    return %c0_i32, %c0_i32_0 : i32, i32
  }
  func.func @transform_3(%arg0: i32) -> (i32, i32) {
    %c0_i32 = arith.constant 0 : i32
    %c0_i32_0 = arith.constant 0 : i32
    %c0_i32_1 = arith.constant 0 : i32
    return %c0_i32, %c0_i32_0 : i32, i32
  }
  func.func @transform_4(%arg0: i32) -> (i32, i32) {
    %c0_i32 = arith.constant 0 : i32
    %c0_i32_0 = arith.constant 0 : i32
    return %arg0, %c0_i32 : i32, i32
  }
}

</mosaic_0001>

<bundles_post_ra>
// kernel: tpu_custom_call.1
= control target key start
LH: loop header
LB: loop body
LE: loop exit
PB: predicated region body
PF: predicated region fallthrough
CT: control target
= control target key end

     0   :  { %9 = vsyncpa [#allocation3], 0  ;;  %s297_s0 = inlined_call_operand.hbm [shape: f32[8,32], index: 0, kind: input, shape index: {}]   ;;  %s298_s1 = inlined_call_operand.vmem [shape: f32[1,32], index: 1, kind: input, shape index: {}]   ;;  %s299_s2 = inlined_call_operand.hbm [shape: f32[32,128], index: 2, kind: input, shape index: {}]   ;;  %s300_s3 = inlined_call_operand.vmem [shape: f32[1,128], index: 3, kind: input, shape index: {}]   ;;  %s301_s4 = inlined_call_operand.hbm [shape: f32[8,128], index: 4, kind: output, shape index: {}]  }
   0x1   :  { %10 = vsyncpa [#allocation6], 0 }
   0x2   :  { %11 = vsyncpa [#allocation4], 0  ;;  %s250_s15 = smov [#allocation2]   ;;  %s251_s17 = smov [#allocation5]  }
   0x3   :  { %s18_s16 = sshll.u32 %s250_s15, 4  ;;  %s29_s18 = sshll.u32 %s251_s17, 4  ;;  %s19_s16 = int_to_ptr.vmem [resolvable:$true] %s18_s16  ;;  %s30_s18 = int_to_ptr.vmem [resolvable:$true] %s29_s18 }
   0x4   :  { %s192_s19 = scalar_lea.vmem %s19_s16, 128  ;;  %p197_p1 = scmp.lt.s32.totalorder %s19_s16, %s19_s16 }
   0x5   :  { %p193_p0 = scmp.ne.s32.totalorder %s19_s16, %s192_s19  ;;  %p198_p2 = scmp.lt.s32.totalorder %s192_s19, %s192_s19 }
   0x7   :  { %p199_p3 = por %p198_p2, %p197_p1 }
   0x9   :  { %p200_p4 = pnand %p199_p3, %p193_p0 }
   0xb   :  { %203 = shalt.err (!%p200_p4)
}
   0xc   :  { %21 = dma.hbm_to_vmem [thread:$0]  %s297_s0, 128, %s19_s16, [#allocation3]  }
   0xd   :  { %s212_s22 = scalar_lea.vmem %s30_s18, 512  ;;  %p217_p6 = scmp.lt.s32.totalorder %s30_s18, %s30_s18 }
   0xe   :  { %p213_p5 = scmp.ne.s32.totalorder %s30_s18, %s212_s22  ;;  %p218_p7 = scmp.lt.s32.totalorder %s212_s22, %s212_s22 }
  0x10   :  { %p219_p8 = por %p218_p7, %p217_p6 }
  0x12   :  { %p220_p9 = pnand %p219_p8, %p213_p5 }
  0x14   :  { %223 = shalt.err (!%p220_p9)
}
  0x15   :  { %s252_s23 = smov 128   ;;  %s253_s24 = smov 8  }
  0x16   :  { %35 = dma.hbm_to_vmem [thread:$0]  %s299_s2, 512, %s30_s18, [#allocation6], %s252_s23, %s252_s23, %s253_s24  }
  0x17   :  { %244 = dma.done.wait [#allocation3], 128  }
  0x18   :  { %245 = vsyncadd [#allocation3], 4294967168 }
  0x19   :  { %246 = dma.done.wait [#allocation6], 512  }
  0x1a   :  { %247 = vsyncadd [#allocation6], 4294966784  ;;  %v254_v0 = vmov 0.0   ;;  %vm255_vm0 = vmmov 0   ;;  %v57_v1 = vld [vmem:[#allocation5 + $0x18] sm:$0xff]  ;;  %v56_v2 = vld [vmem:[#allocation5 + $0x10] sm:$0xff] }
  0x1b   :  { %164 = vmatprep.subr.mxu0 %v254_v0  ;;  %172 = vmatprep.mubr.msk.f32.mxu0 %vm255_vm0, %v254_v0  ;;  %v44_v3 = vld [vmem:[#allocation2] sm:$0xff]  ;;  %v55_v5 = vld [vmem:[#allocation5 + $0x8] sm:$0xff]  ;;  %v54_v7 = vld [vmem:[#allocation5] sm:$0xff]  ;;  %vm65_vm1 = vcmask 261120   ;;  %s256_s29 = smov [#allocation7]  }
  0x1c   :  { %165 = vmatpush3.msra.mxu0 %v57_v1  ;;  %v156_v4 = vld [vmem:[%s298_s1] ss:$0 sm:$0xff]  ;;  %s146_s30 = sshll.u32 %s256_s29, 4  ;;  %s147_s30 = int_to_ptr.vmem [resolvable:$true] %s146_s30 }
  0x1d   :  { %166 = vmatprep.subr.mxu0 %v254_v0  ;;  %v52_v6 = vmul.f32 %v156_v4, %v44_v3  ;;  %v157_v9 = vld [vmem:[%s300_s3] ss:$0 sm:$0xff]  ;;  %s224_s1 = scalar_lea.vmem %s147_s30, 128  ;;  %p229_p11 = scmp.lt.s32.totalorder %s147_s30, %s147_s30 }
  0x1e   :  { %167 = vmatpush3.msra.mxu0 %v56_v2  ;;  %p225_p10 = scmp.ne.s32.totalorder %s147_s30, %s224_s1  ;;  %p230_p12 = scmp.lt.s32.totalorder %s224_s1, %s224_s1 }
  0x1f   :  { %168 = vmatprep.subr.mxu0 %v254_v0  ;;  %182 = vtanh.f32 %v52_v6 }
  0x20   :  { %169 = vmatpush3.msra.mxu0 %v55_v5  ;;  %p231_p13 = por %p230_p12, %p229_p11 }
  0x21   :  { %170 = vmatprep.subr.mxu0 %v254_v0 }
  0x22   :  { %171 = vmatpush3.msra.mxu0 %v54_v7  ;;  %p232_p0 = pnand %p231_p13, %p225_p10 }
  0x2c   :  { %v183_v8 = vpop.eup %182 }
  0x2d   :  { %173 = vmatmul.mubr.msk.f32.vlgmr.msra.gmra.mxu0 %vm65_vm1, %v183_v8 }
  0xed   :  { %v135_v10 = vpop.f32.mrf.mxu0 }
  0xee   :  { %v136_v11 = vadd.f32 %v157_v9, %v135_v10 }
  0xef   :  { %v174_v12 = vpop.f32.mrf.mxu0 }
  0xf0   :  { %139 = vst [vmem:[#allocation7] sm:$0xff] %v136_v11 }
  0xf1   :  { %235 = shalt.err (!%p232_p0)
}
  0xf2   :  { %149 = dma.vmem_to_hbm [thread:$0]  %s147_s30, 128, %s301_s4, [#allocation4]  }
  0xf3   :  { %248 = dma.done.wait [#allocation4], 128  }
  0xf4   :  { %249 = vsyncadd [#allocation4], 4294967168 }
  0xf5   :  { %153 = vsyncpa [#allocation3], 1 }
  0xf6   :  { %154 = vsyncpa [#allocation6], 1 }
  0xf7   :  { %155 = vsyncpa [#allocation4], 1 }

</bundles_post_ra>
